<compile_context>
chip_gen: v7x
topology: tpu7x:2x2x1
jax: 0.10.0
libtpu: 0.0.40
codegen_flags: <defaults>
</compile_context>

<pallas_src>
import functools

import jax
import jax.numpy as jnp
from jax.experimental import pallas as pl
from jax.experimental.pallas import tpu as pltpu


def se_block_kernel(x_ref, w1t_ref, b1_ref, w2t_ref, b2_ref, o_ref, *, inv_hw):
    # x_ref:   (TB, C, HW)  input storage dtype (f32 or bf16)
    # w1t_ref: (C, C//r) f32   b1_ref: (1, C//r) f32
    # w2t_ref: (C//r, C) f32   b2_ref: (1, C)   f32
    # o_ref:   (TB, C, HW)  same dtype as x

    # --- squeeze: global average pool over spatial axis (streaming, f32 acc) --
    pooled = jnp.sum(x_ref[...].astype(jnp.float32), axis=-1) * inv_hw  # (TB, C)

    # --- excitation: fc1 -> relu -> fc2 -> sigmoid (tiny, stays fused) --------
    h = jnp.dot(pooled, w1t_ref[...],
                preferred_element_type=jnp.float32) + b1_ref[...]       # (TB, C//r)
    h = jnp.maximum(h, 0.0)
    s = jnp.dot(h, w2t_ref[...],
                preferred_element_type=jnp.float32) + b2_ref[...]       # (TB, C)
    s = jax.nn.sigmoid(s)                                               # f32

    # --- scale: re-read the ref (VMEM loads are cheap, 3 vld/cycle) so no -----
    # full-block f32 temp is live across the excitation chain.
    o_ref[...] = (x_ref[...].astype(jnp.float32) * s[:, :, None]).astype(o_ref.dtype)


def prepare_se_params(w1, b1, w2, b2):
    """One-time parameter repack (do at init, not per call).

    w1: (C//r, C), b1: (C//r,), w2: (C, C//r), b2: (C,)  ->
    w1t: (C, C//r), b1_2d: (1, C//r), w2t: (C//r, C), b2_2d: (1, C), all f32.
    """
    return (jnp.asarray(w1, jnp.float32).T,
            jnp.asarray(b1, jnp.float32).reshape(1, -1),
            jnp.asarray(w2, jnp.float32).T,
            jnp.asarray(b2, jnp.float32).reshape(1, -1))


def _pick_tb(B, C, HW, itemsize, *, block_budget_bytes=24 << 20, min_steps=4):
    """Batch-tile size.

    VMEM accounting: Pallas double-buffers every blocked operand, so each grid
    step costs ~2x input block + 2x output block (= 4 * C * HW * itemsize per
    batch row) plus small temps/weights.  Also cap TB so the grid keeps at
    least `min_steps` steps when B allows it: v7x has 2 TensorCores sharding
    the 'parallel' batch axis, and multiple steps are what enable DMA/compute
    software pipelining.  No "TB divides B" requirement — the tail block may
    be partial (rows are independent, out-of-bounds writes are masked).
    """
    per_row = 4 * C * HW * itemsize
    tb_fit = max(1, block_budget_bytes // max(per_row, 1))
    steps = max(1, min(B, min_steps))
    tb_steps = max(1, B // steps)
    return max(1, min(B, tb_fit, tb_steps))


def se_block(x, w1t, b1_2d, w2t, b2_2d):
    """x: (B, C, H, W). Params as returned by prepare_se_params()."""
    B, C, H, W = x.shape
    HW = H * W

    # No spatial padding/slice: block last-two dims equal the full (C, HW), so
    # the (8,128) constraint is satisfied; tail stores are masked by Mosaic.
    x3 = x.reshape(B, C, HW)

    itemsize = jnp.dtype(x.dtype).itemsize
    TB = _pick_tb(B, C, HW, itemsize)
    grid = (pl.cdiv(B, TB),)            # partial tail block is safe (independent rows)

    # Explicit scoped-VMEM budget: double-buffered in+out blocks + resident
    # params + headroom; clamp into a range that is safe on v5e/v6e (128 MiB
    # physical) and v7x (64 MiB physical).
    block_bytes = TB * C * HW * itemsize
    param_bytes = 4 * (w1t.size + b1_2d.size + w2t.size + b2_2d.size)
    footprint = 4 * block_bytes + 2 * param_bytes
    vmem_limit = int(min(max(footprint + (4 << 20), 16 << 20), 48 << 20))

    Cr = w1t.shape[1]
    cost = pl.CostEstimate(
        flops=int(2 * B * C * HW + 4 * B * C * Cr),
        transcendentals=int(B * C),
        bytes_accessed=int(2 * B * C * HW * itemsize + param_bytes),
    )

    kernel = functools.partial(se_block_kernel, inv_hw=float(1.0 / HW))

    x_spec = pl.BlockSpec((TB, C, HW), lambda b: (b, 0, 0))
    resident = lambda shape: pl.BlockSpec(shape, lambda b: (0, 0))

    # TODO(synk): for late-stage SE shapes (HW < 128, C >= 512) inside an NHWC
    # model, use a channels-last (B, HW, C) layout so C maps to lanes
    # (lane-dense stores); a standalone transpose here would cost the very HBM
    # pass we are avoiding, so it is only worth it if the producer is NHWC.
    out3 = pl.pallas_call(
        kernel,
        out_shape=jax.ShapeDtypeStruct((B, C, HW), x.dtype),
        grid_spec=pl.GridSpec(
            grid=grid,
            in_specs=[
                x_spec,
                resident(w1t.shape),
                resident(b1_2d.shape),
                resident(w2t.shape),
                resident(b2_2d.shape),
            ],
            out_specs=pl.BlockSpec((TB, C, HW), lambda b: (b, 0, 0)),
        ),
        compiler_params=pltpu.CompilerParams(
            dimension_semantics=("parallel",),
            vmem_limit_bytes=vmem_limit),
        cost_estimate=cost,
    )(x3, w1t, b1_2d, w2t, b2_2d)

    return out3.reshape(B, C, H, W)


def _reference(x, w1, b1, w2, b2):
    # Pure-JAX reference replicating the PyTorch forward (f32 math).
    xf = x.astype(jnp.float32)
    pooled = jnp.mean(xf, axis=(2, 3))                      # (B, C)
    h = jnp.maximum(pooled @ w1.T + b1, 0.0)                # (B, C//r)
    s = jax.nn.sigmoid(h @ w2.T + b2)                       # (B, C)
    return xf * s[:, :, None, None]


if __name__ == "__main__":
    B, C, H, W = 2, 8, 16, 16
    reduction_rate = 4
    Cr = C // reduction_rate

    key = jax.random.PRNGKey(0)
    kx, kw1, kb1, kw2, kb2 = jax.random.split(key, 5)

    x = jax.random.normal(kx, (B, C, H, W), dtype=jnp.float32)
    # Deterministic synthetic parameters (shapes match nn.Linear in the module).
    w1 = jax.random.normal(kw1, (Cr, C), dtype=jnp.float32) * 0.1
    b1 = jax.random.normal(kb1, (Cr,), dtype=jnp.float32) * 0.1
    w2 = jax.random.normal(kw2, (C, Cr), dtype=jnp.float32) * 0.1
    b2 = jax.random.normal(kb2, (C,), dtype=jnp.float32) * 0.1

    w1t, b1_2d, w2t, b2_2d = prepare_se_params(w1, b1, w2, b2)

    # f32 path (tight tolerance vs reference).
    out = jax.block_until_ready(se_block(x, w1t, b1_2d, w2t, b2_2d))
    ref = _reference(x, w1, b1, w2, b2)
    assert out.shape == (B, C, H, W)
    assert jnp.allclose(out, ref, atol=1e-5, rtol=1e-5), "f32 mismatch vs reference"

    # bf16-storage path (halves HBM traffic; vector math stays f32 in-kernel).
    x_bf16 = x.astype(jnp.bfloat16)
    out_bf16 = jax.block_until_ready(se_block(x_bf16, w1t, b1_2d, w2t, b2_2d))
    ref_bf16 = _reference(x_bf16, w1, b1, w2, b2)
    assert out_bf16.dtype == jnp.bfloat16
    assert jnp.allclose(out_bf16.astype(jnp.float32), ref_bf16,
                        atol=2e-2, rtol=2e-2), "bf16 mismatch vs reference"

    print("KERNEL_OK")
</pallas_src>

<mosaic_0001>
module attributes {stable_mosaic.version = 11 : i64} {
  func.func @se_block_kernel(%arg0: i32, %arg1: memref<1x8x256xf32, #tpu.memory_space<vmem>>, %arg2: memref<8x2xf32, #tpu.memory_space<vmem>>, %arg3: memref<1x2xf32, #tpu.memory_space<vmem>>, %arg4: memref<2x8xf32, #tpu.memory_space<vmem>>, %arg5: memref<1x8xf32, #tpu.memory_space<vmem>>, %arg6: memref<1x8x256xf32, #tpu.memory_space<vmem>>) attributes {dimension_semantics = [#tpu.dimension_semantics<parallel>], iteration_bounds = array<i64: 2>, scalar_prefetch = 0 : i64, scratch_operands = 0 : i64, tpu.core_type = #tpu.core_type<tc>, window_params = [{transform_indices = @transform_0, window_bounds = array<i64: 1, 8, 256>}, {pipeline_mode = #tpu.pipeline_mode<synchronous>, transform_indices = @transform_1, window_bounds = array<i64: 8, 2>}, {pipeline_mode = #tpu.pipeline_mode<synchronous>, transform_indices = @transform_2, window_bounds = array<i64: 1, 2>}, {pipeline_mode = #tpu.pipeline_mode<synchronous>, transform_indices = @transform_3, window_bounds = array<i64: 2, 8>}, {pipeline_mode = #tpu.pipeline_mode<synchronous>, transform_indices = @transform_4, window_bounds = array<i64: 1, 8>}, {transform_indices = @transform_5, window_bounds = array<i64: 1, 8, 256>}]} {
    %c0 = arith.constant 0 : index
    %c0_0 = arith.constant 0 : index
    %c0_1 = arith.constant 0 : index
    %0 = vector.load %arg1[%c0, %c0_0, %c0_1] : memref<1x8x256xf32, #tpu.memory_space<vmem>>, vector<1x8x256xf32>
    %cst = arith.constant dense<0.000000e+00> : vector<1x8xf32>
    %1 = vector.multi_reduction <add>, %0, %cst [2] : vector<1x8x256xf32> to vector<1x8xf32>
    %cst_2 = arith.constant 3.906250e-03 : f32
    %2 = vector.broadcast %cst_2 : f32 to vector<1x8xf32>
    %3 = arith.mulf %1, %2 : vector<1x8xf32>
    %c0_3 = arith.constant 0 : index
    %c0_4 = arith.constant 0 : index
    %4 = vector.load %arg2[%c0_3, %c0_4] : memref<8x2xf32, #tpu.memory_space<vmem>>, vector<8x2xf32>
    %cst_5 = arith.constant dense<0.000000e+00> : vector<1x2xf32>
    %5 = tpu.matmul %3, %4, %cst_5 {dimension_numbers = #tpu.dot_dimension_numbers<[1], [0], [0], [1], [0, 0, 1, 1], [], []>} : vector<1x8xf32>, vector<8x2xf32>, vector<1x2xf32> -> vector<1x2xf32>
    %c0_6 = arith.constant 0 : index
    %c0_7 = arith.constant 0 : index
    %6 = vector.load %arg3[%c0_6, %c0_7] : memref<1x2xf32, #tpu.memory_space<vmem>>, vector<1x2xf32>
    %7 = arith.addf %5, %6 : vector<1x2xf32>
    %cst_8 = arith.constant 0.000000e+00 : f32
    %8 = vector.broadcast %cst_8 : f32 to vector<1x2xf32>
    %9 = arith.maximumf %7, %8 : vector<1x2xf32>
    %c0_9 = arith.constant 0 : index
    %c0_10 = arith.constant 0 : index
    %10 = vector.load %arg4[%c0_9, %c0_10] : memref<2x8xf32, #tpu.memory_space<vmem>>, vector<2x8xf32>
    %cst_11 = arith.constant dense<0.000000e+00> : vector<1x8xf32>
    %11 = tpu.matmul %9, %10, %cst_11 {dimension_numbers = #tpu.dot_dimension_numbers<[1], [0], [0], [1], [0, 0, 1, 1], [], []>} : vector<1x2xf32>, vector<2x8xf32>, vector<1x8xf32> -> vector<1x8xf32>
    %c0_12 = arith.constant 0 : index
    %c0_13 = arith.constant 0 : index
    %12 = vector.load %arg5[%c0_12, %c0_13] : memref<1x8xf32, #tpu.memory_space<vmem>>, vector<1x8xf32>
    %13 = arith.addf %11, %12 : vector<1x8xf32>
    %14 = arith.negf %13 : vector<1x8xf32>
    %15 = math.exp %14 : vector<1x8xf32>
    %cst_14 = arith.constant 1.000000e+00 : f32
    %16 = vector.broadcast %cst_14 : f32 to vector<1x8xf32>
    %17 = arith.addf %16, %15 : vector<1x8xf32>
    %18 = arith.divf %16, %17 : vector<1x8xf32>
    %c0_15 = arith.constant 0 : index
    %c0_16 = arith.constant 0 : index
    %c0_17 = arith.constant 0 : index
    %19 = vector.load %arg1[%c0_15, %c0_16, %c0_17] : memref<1x8x256xf32, #tpu.memory_space<vmem>>, vector<1x8x256xf32>
    %20 = vector.shape_cast %18 : vector<1x8xf32> to vector<1x8x1xf32>
    %21 = vector.broadcast %20 : vector<1x8x1xf32> to vector<1x8x256xf32>
    %22 = arith.mulf %19, %21 : vector<1x8x256xf32>
    %c0_18 = arith.constant 0 : index
    %c0_19 = arith.constant 0 : index
    %c0_20 = arith.constant 0 : index
    %23 = vector.load %arg6[%c0_18, %c0_19, %c0_20] : memref<1x8x256xf32, #tpu.memory_space<vmem>>, vector<1x8x256xf32>
    tpu.vector_store %arg6[%c0_18, %c0_19, %c0_20], %22 {strides = array<i32>} : memref<1x8x256xf32, #tpu.memory_space<vmem>>, vector<1x8x256xf32>,
    return
  }
  func.func @transform_0(%arg0: i32) -> (i32, i32, i32) {
    %c0_i32 = arith.constant 0 : i32
    %c0_i32_0 = arith.constant 0 : i32
    %c0_i32_1 = arith.constant 0 : i32
    return %arg0, %c0_i32, %c0_i32_0 : i32, i32, i32
  }
  func.func @transform_1(%arg0: i32) -> (i32, i32) {
    %c0_i32 = arith.constant 0 : i32
    %c0_i32_0 = arith.constant 0 : i32
    %c0_i32_1 = arith.constant 0 : i32
    return %c0_i32, %c0_i32_0 : i32, i32
  }
  func.func @transform_2(%arg0: i32) -> (i32, i32) {
    %c0_i32 = arith.constant 0 : i32
    %c0_i32_0 = arith.constant 0 : i32
    %c0_i32_1 = arith.constant 0 : i32
    return %c0_i32, %c0_i32_0 : i32, i32
  }
  func.func @transform_3(%arg0: i32) -> (i32, i32) {
    %c0_i32 = arith.constant 0 : i32
    %c0_i32_0 = arith.constant 0 : i32
    %c0_i32_1 = arith.constant 0 : i32
    return %c0_i32, %c0_i32_0 : i32, i32
  }
  func.func @transform_4(%arg0: i32) -> (i32, i32) {
    %c0_i32 = arith.constant 0 : i32
    %c0_i32_0 = arith.constant 0 : i32
    %c0_i32_1 = arith.constant 0 : i32
    return %c0_i32, %c0_i32_0 : i32, i32
  }
  func.func @transform_5(%arg0: i32) -> (i32, i32, i32) {
    %c0_i32 = arith.constant 0 : i32
    %c0_i32_0 = arith.constant 0 : i32
    %c0_i32_1 = arith.constant 0 : i32
    return %arg0, %c0_i32, %c0_i32_0 : i32, i32, i32
  }
}

</mosaic_0001>

<bundles_post_ra>
// kernel: tpu_custom_call.1
= control target key start
LH: loop header
LB: loop body
LE: loop exit
PB: predicated region body
PF: predicated region fallthrough
CT: control target
= control target key end

     0   :  { %10 = vsyncpa [#allocation3], 0  ;;  %s907_s0 = inlined_call_operand.hbm [shape: f32[2,8,256], index: 0, kind: input, shape index: {}]   ;;  %s908_s1 = inlined_call_operand.vmem [shape: f32[8,2], index: 1, kind: input, shape index: {}]   ;;  %s909_s2 = inlined_call_operand.vmem [shape: f32[1,2], index: 2, kind: input, shape index: {}]   ;;  %s910_s3 = inlined_call_operand.vmem [shape: f32[2,8], index: 3, kind: input, shape index: {}]   ;;  %s911_s4 = inlined_call_operand.vmem [shape: f32[1,8], index: 4, kind: input, shape index: {}]   ;;  %s912_s5 = inlined_call_operand.hbm [shape: f32[2,8,256], index: 5, kind: output, shape index: {}]  }
   0x1   :  { %12 = vsyncpa [#allocation3 + $0x1], 0 }
   0x2   :  { %13 = vsyncpa [#allocation4], 0 }
   0x3   :  { %15 = vsyncpa [#allocation4 + $0x1], 0  ;;  %s730_s18 = smov 0   ;;  %s732_s19 = smov 0  }
   0x4   :  { %s734_s20 = smov 0   ;;  %s736_s21 = smov 0  }
   0x5 LB: > { %s751_s22 = sadd.s32 4294967295, %s694_s21   ;;  %s512_s23 = sadd.s32 4294967294, %s694_s21   ;;  %s694_s21 = sphi %s736_s21, %s927_s21   ;;  %s690_s20 = sphi %s734_s20, %s926_s20   ;;  %s686_s19 = sphi %s732_s19, %s925_s19   ;;  %s682_s18 = sphi %s730_s18, %s924_s18  }
   0x6   : > { %s755_s24 = sadd.s32 1, %s694_s21   ;;  %s28_s25 = sadd.s32 1, %s690_s20 }
   0x7   : > { %s25_s26 = ssub.s32 %s694_s21, %s755_s24  ;;  %p35_p0 = scmp.ne.s32.totalorder %s690_s20, %s686_s19 }
   0x8   : > { %p26_p1 = scmp.eq.s32.totalorder %s25_s26, 0  ;;  %p36_p2 = scmp.eq.s32.totalorder %s694_s21, 0 }
   0x9   : > { %p41_p3 = scmp.ne.s32.totalorder %s686_s19, %s682_s18  ;;  %p42_p4 = scmp.eq.s32.totalorder %s751_s22, 0 }
   0xa   : > { %s767_s27 = scalar_select %p26_p1, %s690_s20, %s28_s25  }
   0xb   : > { %p769_p5 = por %p36_p2, %p35_p0  ;;  %p773_p6 = por %p42_p4, %p41_p3 }
   0xc   : > { %p149_p7 = scmp.eq.s32.totalorder %s751_s22, 1  ;;  %p155_p8 = scmp.eq.s32.totalorder %s512_s23, 1 }
   0xd   : > { %p558_p10 = scmp.lt.s32.totalorder %s694_s21, 2  ;;  %s187_s7 = sand.u32 1, %s690_s20  }
   0xe   : > { %p780_p11 = por %p149_p7, %p35_p0  ;;  %p784_p12 = por %p155_p8, %p41_p3 }
   0xf   : > { %s530_s8 = sshll.u32 %s694_s21, 8  ;;  %s515_s9 = sshll.u32 %s187_s7, 4 }
  0x10   : > { %s916_s30 = scalar_select %p780_p11, 1, 0 }
  0x11   : > { %s917_s6 = scalar_select %p784_p12, 1, 0 }
  0x12   : > { %s793_s12 = scalar_lea.hbm %s907_s0, %s530_s8  ;;  %s191_s13 = scalar_lea.vmem [#allocation2], %s515_s9 }
  0x13   : > { %s199_s14 = sshll.u32 %s191_s13, 4  ;;  %p797_p13 = pnand %p558_p10, %p769_p5  ;;  %s801_s14 = int_to_ptr.vmem [resolvable:$true] %s199_s14 }
  0x14   : > { %s188_s16 = scalar_lea.sflag [#allocation3], %s187_s7  ;;  %s598_s17 = scalar_lea.hbm %s793_s12, 256 }
  0x15   : > { %p599_p2 = scmp.ne.s32.totalorder %s793_s12, %s598_s17  ;;  %p600_p3 = pneg %p797_p13 }
  0x16   : > { %s603_s26 = scalar_lea.hbm %s907_s0, 512  ;;  %p604_p5 = scmp.lt.u32.totalorder %s793_s12, %s907_s0 }
  0x17   : > { %p601_p4 = pnand %p600_p3, %p599_p2  ;;  %p605_p8 = scmp.lt.u32.totalorder %s603_s26, %s598_s17 }
  0x18   : > { %p607_p9 = scmp.lt.u32.totalorder %s598_s17, %s793_s12 }
  0x19   : > { %p602_p7 = pneg %p601_p4  ;;  %p606_p10 = por %p605_p8, %p604_p5 }
  0x1b   : > { %p608_p0 = por %p607_p9, %p606_p10 }
  0x1d   : > { %p609_p1 = pnand %p608_p0, %p602_p7 }
  0x1f   : > { %612 = shalt.err (!%p609_p1)
}
  0x20   : > { %s613_s7 = scalar_lea.vmem %s801_s14, 256  ;;  %s696_s9 = smov [#allocation2]  }
  0x21   : > { %p614_p2 = scmp.ne.s32.totalorder %s801_s14, %s613_s7  ;;  %s618_s10 = sshll.u32 %s696_s9, 4  ;;  %s619_s10 = int_to_ptr.vmem [resolvable:$false] %s618_s10 }
  0x22   : > { %s620_s11 = scalar_lea.vmem %s619_s10, 512  ;;  %p621_p11 = scmp.lt.s32.totalorder %s801_s14, %s619_s10 }
  0x23   : > { %p616_p4 = pnand %p614_p2, %p600_p3  ;;  %p622_p5 = scmp.lt.s32.totalorder %s620_s11, %s613_s7 }
  0x25   : > { %p617_p12 = pneg %p616_p4  ;;  %p623_p8 = por %p622_p5, %p621_p11 }
  0x27   : > { %p624_p9 = pnand %p623_p8, %p617_p12 }
  0x29   : > { %627 = shalt.err (!%p624_p9)
}
  0x2a   : > { %553 = dma.hbm_to_vmem [thread:$0]  (!%p797_p13), %s793_s12, 256, %s801_s14, %s188_s16  }
  0x2b   : > { %p919_p0 = scmp.lt.s32.totalorder %s694_s21, 3  ;;  %p920_p1 = scmp.ge.s32.totalorder %s694_s21, 1 }
  0x2d   : > { %p205_p3 = pnand %p920_p1, %p919_p0 }
  0x2e   : > { %s835_s13 = sand.u32 (!%p205_p3), 1, %s686_s19  }
  0x2f   : > { %208 = sbr.rel (%p205_p3) target bundleno = 793 (0x319), region = 40  ;;  %s519_s17 = sshll.u32 (!%p205_p3), %s835_s13, 4 }
  0x30   : > { %s211_s23 = scalar_lea.sflag (!%p205_p3), [#allocation3], %s835_s13  ;;  %s214_s15 = scalar_lea.vmem (!%p205_p3), [#allocation2], %s519_s17 }
  0x36   : > { %673 = dma.done.wait (%p773_p6), %s211_s23, 256  }
  0x37   : > { %675 = vsyncadd (%p773_p6), %s211_s23, 4294967040  ;;  %v241_v0 = vld [vmem:[%s214_s15] sm:$0xff]  ;;  %v242_v1 = vld [vmem:[%s214_s15 + $0x8] sm:$0xff]  ;;  %v697_v3 = vmov 0.0   ;;  %vm698_vm0 = vmmov 0   ;;  %v250_v5 = vlaneseq  ;;  %vm256_vm1 = vcmask 64512  }
  0x38   : > { %v243_v2 = vadd.f32 %v242_v1, %v241_v0  ;;  %536 = vmatprep.subr.mxu0 %v697_v3  ;;  %v247_v4 = vld [vmem:[%s908_s1] sm:$0xff]  ;;  %541 = vmatprep.subr.mxu1 %v697_v3  ;;  %vm336_vm2 = vcmask 1041408   ;;  %vm332_vm3 = vcmask 15360   ;;  %s531_s7 = sshll.u32 %s751_s22, 8  ;;  %s240_s9 = scalar_lea.vmem [#allocation5], %s519_s17 }
  0x39   : > { %537 = vmatpush3.msra.mxu0 %v247_v4  ;;  %538 = vmatprep.mubr.msk.f32.mxu0 %vm698_vm0, %v697_v3  ;;  %v251_v6 = vand.u32 127, %v250_v5  ;;  %v253_v7 = vshrl.u32 %v250_v5, 7  ;;  %v330_v12 = vld [vmem:[%s910_s3] sm:$0x3]  ;;  %s442_s10 = sshll.u32 %s240_s9, 4  ;;  %s863_s15 = scalar_lea.hbm %s912_s5, %s531_s7  ;;  %s865_s10 = int_to_ptr.vmem [resolvable:$true] %s442_s10 }
  0x3a   : > { %244 = vadd.xlane.f32.xlu0 %v243_v2  ;;  %543 = vmatprep.mubr.msk.f32.mxu1 %vm698_vm0, %v697_v3  ;;  %v248_v13 = vld [vmem:[%s909_s2] sm:$0x1]  ;;  %s428_s12 = scalar_lea.sflag [#allocation4], %s835_s13  ;;  %s628_s22 = scalar_lea.vmem %s865_s10, 256 }
  0x3b   : > { %v254_v8 = vsub.s32 %v251_v6, %v253_v7  ;;  %542 = vmatpush3.msk.msra.mxu1 %vm336_vm2, %v330_v12  ;;  %v331_v18 = vld [vmem:[%s911_s4] sm:$0x1]  ;;  %v418_v25 = vsub.s32 0, %v253_v7  ;;  %p629_p6 = scmp.ne.s32.totalorder %s865_s10, %s628_s22  ;;  %p921_p11 = scmp.ne.s32.totalorder %s916_s30, 0 }
  0x3c   : > { %s699_s17 = smov [#allocation5]  }
  0x3d   : > { %p630_p12 = pnand %p629_p6, %p921_p11  ;;  %s632_s14 = sshll.u32 %s699_s17, 4  ;;  %s633_s14 = int_to_ptr.vmem [resolvable:$false] %s632_s14 }
  0x3e   : > { %s634_s29 = scalar_lea.vmem %s633_s14, 512  ;;  %p635_p7 = scmp.lt.s32.totalorder %s865_s10, %s633_s14 }
  0x3f   : > { %p631_p13 = pneg %p630_p12  ;;  %p636_p10 = scmp.lt.s32.totalorder %s634_s29, %s628_s22 }
  0x41   : > { %p637_p2 = por %p636_p10, %p635_p7 }
  0x43   : > { %p638_p4 = pnand %p637_p2, %p631_p13 }
  0xc7   : > { %v245_v9 = vpop.xlane.xlu0 %244 }
  0xc8   : > { %v246_v10 = vmul.f32 0.00390625, %v245_v9 }
  0xca   : > { %v255_v11 = vrot.slane %v246_v10, %v254_v8 }
  0xcc   : > { %539 = vmatmul.mubr.msk.f32.vlgmr.msra.gmra.mrb[0].mxu0 %vm256_vm1, %v255_v11 }
 0x19f   : > { %v325_v14 = vpop.f32.mrb[0].mxu0 }
 0x1a0   : > { %v326_v15 = vadd.f32 %v325_v14, %v248_v13  ;;  %v540_v16 = vpop.f32.mrb[1].mxu0 }
 0x1a2   : > { %v329_v17 = vmax.f32 %v326_v15, 0.0 }
 0x1a4   : > { %544 = vmatmul.mubr.msk.f32.vlgmr.msra.gmra.mrb[0].mxu1 %vm332_vm3, %v329_v17 }
 0x277   : > { %v406_v19 = vpop.f32.mrb[0].mxu1 }
 0x278   : > { %v407_v20 = vadd.f32 %v406_v19, %v331_v18  ;;  %v545_v21 = vpop.f32.mrb[1].mxu1 }
 0x27a   : > { %v524_v22 = vmul.f32 -1.442695, %v407_v20 }
 0x27c   : > { %594 = vpow2.f32 %v524_v22 }
 0x286   : > { %v595_v23 = vpop.eup %594 }
 0x287   : > { %v413_v24 = vadd.f32 1.0, %v595_v23 }
 0x289   : > { %596 = vrcp.f32 %v413_v24 }
 0x293   : > { %v597_v26 = vpop.eup %596 }
 0x294   : > { %v419_v27 = vrot.slane %v597_v26, %v418_v25 }
 0x296   : > { %421 = vbcast.lane.b32.xlu0 %v419_v27, 256 }
 0x308   : > { %v422_v28 = vpop.permute.xlu0 %421 }
 0x309   : > { %v423_v29 = vmul.f32 %v422_v28, %v241_v0  ;;  %v424_v30 = vmul.f32 %v422_v28, %v242_v1 }
 0x30b   : > { %425 = vst [vmem:[%s240_s9] sm:$0xff] %v423_v29  ;;  %426 = vst [vmem:[%s240_s9 + $0x8] sm:$0xff] %v424_v30 }
 0x30c   : > { %641 = shalt.err (!%p638_p4)
}
 0x30d   : > { %s642_s13 = scalar_lea.hbm %s863_s15, 256  ;;  %s646_s26 = scalar_lea.hbm %s912_s5, 512 }
 0x30e   : > { %p643_p5 = scmp.ne.s32.totalorder %s863_s15, %s642_s13  ;;  %p647_p0 = scmp.lt.u32.totalorder %s863_s15, %s912_s5 }
 0x30f   : > { %p648_p1 = scmp.lt.u32.totalorder %s646_s26, %s642_s13  ;;  %p650_p6 = scmp.lt.u32.totalorder %s642_s13, %s863_s15 }
 0x310   : > { %p644_p8 = pnand %p643_p5, %p921_p11 }
 0x311   : > { %p649_p3 = por %p648_p1, %p647_p0 }
 0x312   : > { %p645_p9 = pneg %p644_p8 }
 0x313   : > { %p651_p12 = por %p650_p6, %p649_p3 }
 0x315   : > { %p652_p13 = pnand %p651_p12, %p645_p9 }
 0x317   : > { %655 = shalt.err (!%p652_p13)
}
 0x318   : > { %548 = dma.vmem_to_hbm [thread:$0]  (%p921_p11), %s865_s10, 256, %s863_s15, %s428_s12  }
 0x319 PF: > { %s454_s7 = sand.u32 1, %s682_s18   ;;  %p922_p7 = scmp.ne.s32.totalorder %s917_s6, 0 }
 0x31a   : > { %p923_p10 = scmp.ge.s32.totalorder %s694_s21, 2  ;;  %s455_s9 = scalar_lea.sflag [#allocation4], %s454_s7 }
 0x31c   : > { %p555_p2 = pnand %p923_p10, %p922_p7 }
 0x31e   : > { %677 = dma.done.wait (!%p555_p2), %s455_s9, 256  }
 0x31f   : > { %679 = vsyncadd (!%p555_p2), %s455_s9, 4294967040  ;;  %p18_p4 = scmp.ge.s32.totalorder %s755_s24, 4   ;;  %s924_s18 = smov %s686_s19 }
 0x320   : > { %s925_s19 = smov %s690_s20  ;;  %s926_s20 = smov %s767_s27 }
 0x321   : > { %s927_s21 = smov %s755_s24  ;;  %20 = sbr.rel (!%p18_p4) target bundleno = 5 (0x5), region = 85 }
 0x328   :  { %460 = vsyncpa [#allocation3], 1 }
 0x329   :  { %462 = vsyncpa [#allocation3 + $0x1], 1 }
 0x32a   :  { %463 = vsyncpa [#allocation4], 1 }
 0x32b   :  { %465 = vsyncpa [#allocation4 + $0x1], 1 }

</bundles_post_ra>
